<compile_context>
chip_gen: v5e
topology: v5e:2x2
jax: 0.10.0
libtpu: 0.0.40
codegen_flags: <defaults>
</compile_context>

<pallas_src>
import functools

import jax
import jax.numpy as jnp
from jax.experimental import pallas as pl
from jax.experimental.pallas import tpu as pltpu

_VPU_MAX_C = 8  # <= this many channels: unrolled VPU FMAs; above: MXU matmul.


def _round_up(x, m):
    return ((x + m - 1) // m) * m


def prenorm_kernel(x_ref, w_ref, b_ref, o_ref, *, eps, mxu_bf16):
    # x_ref: (1, C, S) tile.  Spatial sits on the lane axis (>=128, lane-dense
    # stores); channels sit on the sublane axis.
    #
    # Ragged-tail invariant: when HW % tile_s != 0, the last spatial block's
    # out-of-bounds lanes hold undefined VMEM data.  Every op below is
    # per-lane (the channel reduction and the 1x1 conv contract over sublanes
    # only), so garbage lanes can never contaminate valid lanes, and Pallas
    # masks them on HBM writeback.  Do NOT add spatial (lane-axis) reductions
    # here without reinstating padding.
    x = x_ref[0].astype(jnp.float32)                       # (C, S)
    mean = jnp.mean(x, axis=0, keepdims=True)              # reduce over channels
    diff = x - mean
    var = jnp.mean(diff * diff, axis=0, keepdims=True)     # biased (unbiased=False)
    xn = diff * jax.lax.rsqrt(var + eps)                   # gain folded into w_eff

    bias = b_ref[...].astype(jnp.float32)                  # (C_out, 1)
    c_out, c_in = w_ref.shape

    if c_in <= _VPU_MAX_C:
        # Tiny channel count: a (C,C)x(C,S) MXU matmul wastes the tile; do the
        # 1x1 conv as c_in unrolled VPU FMAs (trace-time unroll).
        w_eff = w_ref[...].astype(jnp.float32)
        acc = jnp.zeros((c_out, xn.shape[1]), jnp.float32)
        for c in range(c_in):
            acc = acc + w_eff[:, c:c + 1] * xn[c:c + 1, :]
        y = acc + bias
    else:
        # MXU path: w_ref is already bf16 (pre-cast once in the wrapper) when
        # mxu_bf16; only the activations are cast per tile.  f32 accumulation.
        rhs = xn.astype(jnp.bfloat16) if mxu_bf16 else xn
        y = jnp.dot(w_ref[...], rhs, preferred_element_type=jnp.float32) + bias

    o_ref[0] = y.astype(o_ref.dtype)


def prenorm(x_nchw, g, w, b, *, tile_s=1024, mxu_bf16=True):
    """x_nchw: (B, C, H, W). g: (C,) LayerNorm gain. w: (C_in, C_out). b: (C_out,)."""
    B, C, H, W = x_nchw.shape
    HW = H * W
    itemsize = jnp.dtype(x_nchw.dtype).itemsize
    eps = 1e-5 if x_nchw.dtype == jnp.float32 else 1e-3
    use_mxu = C > _VPU_MAX_C
    w_itemsize = 2 if (mxu_bf16 and use_mxu) else 4

    # --- generation-aware VMEM budget -------------------------------------
    # ~40 MiB limit on v7x (64 MiB/TC physical), ~80 MiB on v5e/v6e (128 MiB).
    try:
        vmem_cap = getattr(pltpu.get_tpu_info(), "vmem_capacity_bytes",
                           64 * 1024 * 1024)
    except Exception:  # not on a real TPU (e.g. interpret mode): be conservative
        vmem_cap = 64 * 1024 * 1024
    vmem_limit = min(96 * 1024 * 1024, (vmem_cap * 5) // 8)
    budget = vmem_limit - 2 * 1024 * 1024   # headroom for Mosaic internal scratch

    # Per spatial-lane bytes: 2x double-buffered input tile + 2x double-buffered
    # output tile (itemsize each) + ~4 f32 in-kernel temporaries (x upcast,
    # diff, xn, acc/result).  Weight/bias are single-buffered (Buffered(1)).
    per_lane = C * (4 * itemsize + 4 * 4)
    w_bytes = C * C * w_itemsize + 4 * C + 1024
    max_tile = (budget - w_bytes) // per_lane
    tile_cap = max(128, (max_tile // 128) * 128)
    tile_s = min(tile_s, tile_cap)
    tile_s = max(tile_s, min(512, tile_cap))   # keep >=512 lanes when budget allows (v5e)
    tile_s = min(tile_s, _round_up(HW, 128))   # never bigger than needed

    x3d = x_nchw.reshape(B, C, HW)

    # Fold the LayerNorm gain into the 1x1-conv weight once, outside the grid,
    # and pre-cast it for the MXU path (halves its VMEM footprint too).
    w_eff = jnp.transpose(w.astype(jnp.float32) * g.astype(jnp.float32)[:, None])  # (C_out, C_in)
    if w_itemsize == 2:
        w_eff = w_eff.astype(jnp.bfloat16)
    b_col = b.astype(jnp.float32).reshape(C, 1)

    kernel = functools.partial(prenorm_kernel, eps=eps, mxu_bf16=mxu_bf16)

    out3d = pl.pallas_call(
        kernel,
        out_shape=jax.ShapeDtypeStruct((B, C, HW), x_nchw.dtype),
        grid_spec=pltpu.PrefetchScalarGridSpec(
            num_scalar_prefetch=0,
            grid=(B, pl.cdiv(HW, tile_s)),   # no wrapper pad: ragged tail masked on store
            in_specs=[
                pl.BlockSpec((1, C, tile_s), lambda bi, si: (bi, 0, si)),     # x tile
                pl.BlockSpec((C, C), lambda bi, si: (0, 0),
                             pipeline_mode=pl.Buffered(1)),                   # folded weight
                pl.BlockSpec((C, 1), lambda bi, si: (0, 0),
                             pipeline_mode=pl.Buffered(1)),                   # conv bias
            ],
            out_specs=pl.BlockSpec((1, C, tile_s), lambda bi, si: (bi, 0, si)),
        ),
        compiler_params=pltpu.CompilerParams(
            dimension_semantics=("parallel", "parallel"),
            vmem_limit_bytes=vmem_limit,
        ),
    )(x3d, w_eff, b_col)

    return out3d.reshape(B, C, H, W)


def prenorm_ref(x_nchw, g, w, b):
    """Pure-JAX reference matching the PyTorch forward (LayerNorm then 1x1 conv)."""
    eps = 1e-5 if x_nchw.dtype == jnp.float32 else 1e-3
    mean = jnp.mean(x_nchw, axis=1, keepdims=True)
    var = jnp.mean((x_nchw - mean) ** 2, axis=1, keepdims=True)
    xn = (x_nchw - mean) * jax.lax.rsqrt(var + eps) * g.reshape(1, -1, 1, 1)
    y = jnp.einsum("bchw,cd->bdhw", xn, w) + b.reshape(1, -1, 1, 1)
    return y


def _make_params(key, c_in, c_out):
    kg, kw, kb = jax.random.split(key, 3)
    g = 1.0 + 0.1 * jax.random.normal(kg, (c_in,), dtype=jnp.float32)     # LayerNorm gain
    w = jax.random.normal(kw, (c_in, c_out), dtype=jnp.float32) * 0.1     # 1x1 conv weight
    b = jax.random.normal(kb, (c_out,), dtype=jnp.float32) * 0.1          # 1x1 conv bias
    return g, w, b


if __name__ == "__main__":
    key = jax.random.PRNGKey(0)
    k1, k2, k3, kp1, kp2, kp3 = jax.random.split(key, 6)

    # 1) Tiny-C shape from the spec (B=2, C=4, 16x16): VPU-FMA path, f32.
    B, C, H, W = 2, 4, 16, 16
    x = jax.random.normal(k1, (B, C, H, W), dtype=jnp.float32)
    g, w, b = _make_params(kp1, C, C)
    out = prenorm(x, g, w, b)
    jax.block_until_ready(out)
    ref = prenorm_ref(x, g, w, b)
    assert out.shape == (B, C, H, W)
    assert jnp.allclose(out, ref, atol=1e-4, rtol=1e-4), "mismatch (VPU path)"

    # 2) Larger C (64): exercises the MXU path with the pre-cast bf16 weight.
    B2, C2, H2, W2 = 1, 64, 16, 16
    x2 = jax.random.normal(k2, (B2, C2, H2, W2), dtype=jnp.float32)
    g2, w2, b2 = _make_params(kp2, C2, C2)
    out2 = prenorm(x2, g2, w2, b2, mxu_bf16=True)
    jax.block_until_ready(out2)
    ref2 = prenorm_ref(x2, g2, w2, b2)
    assert jnp.allclose(out2, ref2, atol=2e-2, rtol=2e-2), "mismatch (MXU bf16 path)"

    # 3) Ragged spatial size (HW=100, not a multiple of 128): exercises the
    #    no-pad masked-tail path.
    B3, C3, H3, W3 = 1, 4, 10, 10
    x3 = jax.random.normal(k3, (B3, C3, H3, W3), dtype=jnp.float32)
    g3, w3, b3 = _make_params(kp3, C3, C3)
    out3 = prenorm(x3, g3, w3, b3)
    jax.block_until_ready(out3)
    ref3 = prenorm_ref(x3, g3, w3, b3)
    assert jnp.allclose(out3, ref3, atol=1e-4, rtol=1e-4), "mismatch (ragged tail)"

    print("KERNEL_OK")
</pallas_src>

<mosaic_0001>
module attributes {stable_mosaic.version = 11 : i64} {
  func.func @prenorm_kernel(%arg0: i32, %arg1: i32, %arg2: memref<1x4x256xf32, #tpu.memory_space<vmem>>, %arg3: memref<4x4xf32, #tpu.memory_space<vmem>>, %arg4: memref<4x1xf32, #tpu.memory_space<vmem>>, %arg5: memref<1x4x256xf32, #tpu.memory_space<vmem>>) attributes {dimension_semantics = [#tpu.dimension_semantics<parallel>, #tpu.dimension_semantics<parallel>], iteration_bounds = array<i64: 2, 1>, scalar_prefetch = 0 : i64, scratch_operands = 0 : i64, tpu.core_type = #tpu.core_type<tc>, window_params = [{transform_indices = @transform_0, window_bounds = array<i64: 1, 4, 256>}, {pipeline_mode = #tpu.pipeline_mode<synchronous>, transform_indices = @transform_1, window_bounds = array<i64: 4, 4>}, {pipeline_mode = #tpu.pipeline_mode<synchronous>, transform_indices = @transform_2, window_bounds = array<i64: 4, 1>}, {transform_indices = @transform_3, window_bounds = array<i64: 1, 4, 256>}]} {
    %c0 = arith.constant 0 : index
    %c0_0 = arith.constant 0 : index
    %c0_1 = arith.constant 0 : index
    %0 = vector.load %arg2[%c0, %c0_0, %c0_1] : memref<1x4x256xf32, #tpu.memory_space<vmem>>, vector<1x4x256xf32>
    %1 = vector.shape_cast %0 : vector<1x4x256xf32> to vector<4x256xf32>
    %cst = arith.constant dense<0.000000e+00> : vector<256xf32>
    %2 = vector.multi_reduction <add>, %1, %cst [0] : vector<4x256xf32> to vector<256xf32>
    %3 = vector.shape_cast %2 : vector<256xf32> to vector<1x256xf32>
    %cst_2 = arith.constant 4.000000e+00 : f32
    %4 = vector.broadcast %cst_2 : f32 to vector<1x256xf32>
    %5 = arith.divf %3, %4 : vector<1x256xf32>
    %6 = vector.broadcast %5 : vector<1x256xf32> to vector<4x256xf32>
    %7 = arith.subf %1, %6 : vector<4x256xf32>
    %8 = arith.mulf %7, %7 : vector<4x256xf32>
    %cst_3 = arith.constant dense<0.000000e+00> : vector<256xf32>
    %9 = vector.multi_reduction <add>, %8, %cst_3 [0] : vector<4x256xf32> to vector<256xf32>
    %10 = vector.shape_cast %9 : vector<256xf32> to vector<1x256xf32>
    %cst_4 = arith.constant 4.000000e+00 : f32
    %11 = vector.broadcast %cst_4 : f32 to vector<1x256xf32>
    %12 = arith.divf %10, %11 : vector<1x256xf32>
    %cst_5 = arith.constant 9.99999974E-6 : f32
    %13 = vector.broadcast %cst_5 : f32 to vector<1x256xf32>
    %14 = arith.addf %12, %13 : vector<1x256xf32>
    %15 = math.rsqrt %14 : vector<1x256xf32>
    %16 = vector.broadcast %15 : vector<1x256xf32> to vector<4x256xf32>
    %17 = arith.mulf %7, %16 : vector<4x256xf32>
    %c0_6 = arith.constant 0 : index
    %c0_7 = arith.constant 0 : index
    %18 = vector.load %arg4[%c0_6, %c0_7] : memref<4x1xf32, #tpu.memory_space<vmem>>, vector<4x1xf32>
    %c0_8 = arith.constant 0 : index
    %c0_9 = arith.constant 0 : index
    %19 = vector.load %arg3[%c0_8, %c0_9] : memref<4x4xf32, #tpu.memory_space<vmem>>, vector<4x4xf32>
    %cst_10 = arith.constant 0.000000e+00 : f32
    %20 = vector.broadcast %cst_10 : f32 to vector<4x256xf32>
    %21 = vector.extract_strided_slice %19 {offsets = [0, 0], sizes = [4, 1], strides = [1, 1]} : vector<4x4xf32> to vector<4x1xf32>
    %22 = vector.extract_strided_slice %17 {offsets = [0, 0], sizes = [1, 256], strides = [1, 1]} : vector<4x256xf32> to vector<1x256xf32>
    %23 = vector.broadcast %21 : vector<4x1xf32> to vector<4x256xf32>
    %24 = vector.broadcast %22 : vector<1x256xf32> to vector<4x256xf32>
    %25 = arith.mulf %23, %24 : vector<4x256xf32>
    %26 = arith.addf %20, %25 : vector<4x256xf32>
    %27 = vector.extract_strided_slice %19 {offsets = [0, 1], sizes = [4, 1], strides = [1, 1]} : vector<4x4xf32> to vector<4x1xf32>
    %28 = vector.extract_strided_slice %17 {offsets = [1, 0], sizes = [1, 256], strides = [1, 1]} : vector<4x256xf32> to vector<1x256xf32>
    %29 = vector.broadcast %27 : vector<4x1xf32> to vector<4x256xf32>
    %30 = vector.broadcast %28 : vector<1x256xf32> to vector<4x256xf32>
    %31 = arith.mulf %29, %30 : vector<4x256xf32>
    %32 = arith.addf %26, %31 : vector<4x256xf32>
    %33 = vector.extract_strided_slice %19 {offsets = [0, 2], sizes = [4, 1], strides = [1, 1]} : vector<4x4xf32> to vector<4x1xf32>
    %34 = vector.extract_strided_slice %17 {offsets = [2, 0], sizes = [1, 256], strides = [1, 1]} : vector<4x256xf32> to vector<1x256xf32>
    %35 = vector.broadcast %33 : vector<4x1xf32> to vector<4x256xf32>
    %36 = vector.broadcast %34 : vector<1x256xf32> to vector<4x256xf32>
    %37 = arith.mulf %35, %36 : vector<4x256xf32>
    %38 = arith.addf %32, %37 : vector<4x256xf32>
    %39 = vector.extract_strided_slice %19 {offsets = [0, 3], sizes = [4, 1], strides = [1, 1]} : vector<4x4xf32> to vector<4x1xf32>
    %40 = vector.extract_strided_slice %17 {offsets = [3, 0], sizes = [1, 256], strides = [1, 1]} : vector<4x256xf32> to vector<1x256xf32>
    %41 = vector.broadcast %39 : vector<4x1xf32> to vector<4x256xf32>
    %42 = vector.broadcast %40 : vector<1x256xf32> to vector<4x256xf32>
    %43 = arith.mulf %41, %42 : vector<4x256xf32>
    %44 = arith.addf %38, %43 : vector<4x256xf32>
    %45 = vector.broadcast %18 : vector<4x1xf32> to vector<4x256xf32>
    %46 = arith.addf %44, %45 : vector<4x256xf32>
    %c0_11 = arith.constant 0 : index
    %c0_12 = arith.constant 0 : index
    %c0_13 = arith.constant 0 : index
    %47 = vector.load %arg5[%c0_11, %c0_12, %c0_13] : memref<1x4x256xf32, #tpu.memory_space<vmem>>, vector<1x4x256xf32>
    %48 = vector.shape_cast %47 : vector<1x4x256xf32> to vector<4x256xf32>
    %49 = vector.shape_cast %46 : vector<4x256xf32> to vector<1x4x256xf32>
    tpu.vector_store %arg5[%c0_11, %c0_12, %c0_13], %49 {strides = array<i32>} : memref<1x4x256xf32, #tpu.memory_space<vmem>>, vector<1x4x256xf32>,
    return
  }
  func.func @transform_0(%arg0: i32, %arg1: i32) -> (i32, i32, i32) {
    %c0_i32 = arith.constant 0 : i32
    %c0_i32_0 = arith.constant 0 : i32
    return %arg0, %c0_i32, %arg1 : i32, i32, i32
  }
  func.func @transform_1(%arg0: i32, %arg1: i32) -> (i32, i32) {
    %c0_i32 = arith.constant 0 : i32
    %c0_i32_0 = arith.constant 0 : i32
    %c0_i32_1 = arith.constant 0 : i32
    return %c0_i32, %c0_i32_0 : i32, i32
  }
  func.func @transform_2(%arg0: i32, %arg1: i32) -> (i32, i32) {
    %c0_i32 = arith.constant 0 : i32
    %c0_i32_0 = arith.constant 0 : i32
    %c0_i32_1 = arith.constant 0 : i32
    return %c0_i32, %c0_i32_0 : i32, i32
  }
  func.func @transform_3(%arg0: i32, %arg1: i32) -> (i32, i32, i32) {
    %c0_i32 = arith.constant 0 : i32
    %c0_i32_0 = arith.constant 0 : i32
    return %arg0, %c0_i32, %arg1 : i32, i32, i32
  }
}

</mosaic_0001>

<bundles_post_ra>
// kernel: tpu_custom_call.1
= control target key start
LH: loop header
LB: loop body
LE: loop exit
PB: predicated region body
PF: predicated region fallthrough
CT: control target
= control target key end

     0   :  { %8 = vsyncpa [#allocation3], 0  ;;  %s845_s0 = inlined_call_operand.hbm [shape: f32[2,4,256], index: 0, kind: input, shape index: {}]   ;;  %s846_s1 = inlined_call_operand.vmem [shape: f32[4,4], index: 1, kind: input, shape index: {}]   ;;  %s847_s2 = inlined_call_operand.vmem [shape: f32[4,1], index: 2, kind: input, shape index: {}]   ;;  %s848_s3 = inlined_call_operand.hbm [shape: f32[2,4,256], index: 3, kind: output, shape index: {}]  }
   0x1   :  { %10 = vsyncpa [#allocation3 + $0x1], 0 }
   0x2   :  { %11 = vsyncpa [#allocation4], 0 }
   0x3   :  { %13 = vsyncpa [#allocation4 + $0x1], 0  ;;  %s708_s12 = smov 0   ;;  %s710_s13 = smov 0  }
   0x4   :  { %s712_s14 = smov 0   ;;  %s714_s15 = smov 0  }
   0x5   :  { %s716_s16 = smov 0   ;;  %s718_s17 = smov 0  }
   0x6 LB: > { %s473_s18 = sadd.s32 4294967295, %s681_s17   ;;  %s474_s19 = sadd.s32 4294967294, %s681_s17   ;;  %s681_s17 = sphi %s718_s17, %s19_s17   ;;  %s677_s16 = sphi %s716_s16, %s857_s16   ;;  %s673_s15 = sphi %s714_s15, %s856_s15   ;;  %s669_s14 = sphi %s712_s14, %s855_s14   ;;  %s665_s13 = sphi %s710_s13, %s854_s13   ;;  %s661_s12 = sphi %s708_s12, %s853_s12  }
   0x7   : > { %s31_s20 = sadd.s32 1, %s677_s16  ;;  %s40_s21 = sadd.s32 1, %s669_s14 }
   0x8   : > { %p33_p0 = scmp.ge.s32.totalorder %s31_s20, 2  ;;  %p47_p1 = scmp.ne.s32.totalorder %s669_s14, %s665_s13 }
   0x9   : > { %p48_p2 = scmp.eq.s32.totalorder %s681_s17, 0  ;;  %p53_p3 = scmp.ne.s32.totalorder %s665_s13, %s661_s12 }
   0xa   : > { %s859_s20 = smov (%p33_p0, %s31_s20), 0  ;;  %p54_p5 = scmp.eq.s32.totalorder %s473_s18, 0 }
   0xb   : > { %p749_p4 = por %p48_p2, %p47_p1  ;;  %s35_s23 = ssub.s32 %s677_s16, %s859_s20 }
   0xc   : > { %p121_p6 = scmp.eq.s32.totalorder %s473_s18, 1  ;;  %p38_p7 = scmp.eq.s32.totalorder %s35_s23, 0 }
   0xd   : > { %p755_p8 = por %p54_p5, %p53_p3  ;;  %p127_p10 = scmp.eq.s32.totalorder %s474_s19, 1 }
   0xe   : > { %p759_p9 = por %p121_p6, %p47_p1  ;;  %p476_p12 = scmp.ge.s32.totalorder %s681_s17, 2 }
   0xf   : > { %s764_s26 = scalar_select %p38_p7, %s669_s14, %s40_s21  }
  0x10   : > { %p766_p11 = por %p127_p10, %p53_p3  ;;  %p502_p13 = scmp.lt.s32.totalorder %s681_s17, 2 }
  0x11   : > { %s153_s28 = sand.u32 1, %s669_s14   ;;  %s488_s30 = sshll.u32 %s677_s16, 3 }
  0x12   : > { %s477_s29 = sshll.u32 %s153_s28, 3  ;;  %s164_s6 = scalar_lea.hbm %s845_s0, %s488_s30 }
  0x13   : > { %s157_s7 = scalar_lea.vmem [#allocation2], %s477_s29  ;;  %s166_s9 = sshll.u32 %s164_s6, 4  ;;  %s167_s9 = int_to_ptr.hbm [resolvable:$true] %s166_s9 }
  0x14   : > { %s168_s8 = sshll.u32 %s157_s7, 4  ;;  %p495_p0 = pnand %p502_p13, %p749_p4  ;;  %s169_s8 = int_to_ptr.vmem [resolvable:$true] %s168_s8 }
  0x15   : > { %p480_p1 = scmp.ge.s32.totalorder %s681_s17, 1  ;;  %p173_p2 = scmp.lt.s32.totalorder %s681_s17, 3 }
  0x16   : > { %s154_s10 = scalar_lea.sflag [#allocation3], %s153_s28 }
  0x17   : > { %497 = dma.hbm_to_vmem [thread:$0]  (!%p495_p0), %s167_s9, 128, %s169_s8, %s154_s10  }
  0x18   : > { %p174_p3 = pnand %p480_p1, %p173_p2 }
  0x19   : > { %s782_s11 = sand.u32 (!%p174_p3), 1, %s665_s13  }
  0x1a   : > { %177 = sbr.rel (%p174_p3) target bundleno = 174 (0xae), region = 32  ;;  %s481_s18 = sshll.u32 (!%p174_p3), %s782_s11, 3 }
  0x1b   : > { %s180_s19 = scalar_lea.sflag (!%p174_p3), [#allocation3], %s782_s11  ;;  %s183_s21 = scalar_lea.vmem (!%p174_p3), [#allocation2], %s481_s18 }
  0x1f   : > { %652 = dma.done.wait (%p755_p8), %s180_s19, 128  }
  0x20   : > { %654 = vsyncadd (%p755_p8), %s180_s19, 4294967168  ;;  %v683_v0 = vmov 4.0   ;;  %v684_v1 = vmov 0   ;;  %v685_v2 = vmov 2   ;;  %v209_v4 = vld [vmem:[%s183_s21] sm:$0xff]  ;;  %vm216_vm0 = vcmask 1043456  }
  0x21   : > { %563 = vrcp.f32 %v683_v0  ;;  %557 = vset.pattern.permute.xlu0 %v684_v1  ;;  %559 = vset.pattern.permute.xlu1 %v685_v2  ;;  %v298_v5 = vld [vmem:[%s846_s1] sm:$0xf]  ;;  %211 = vst [vmem:[#allocation1] ss:$2 sm:$0xff] %v209_v4  ;;  %v686_v12 = vmov 1   ;;  %v687_v13 = vmov 3  }
  0x22   : > { %561 = vset.pattern.permute.xlu2 %v684_v1  ;;  %301 = vperm.xlu0 %557, %v298_v5   ;;  %v297_v14 = vld [vmem:[%s847_s2] sm:$0xf]  ;;  %s489_s29 = sshll.u32 %s673_s15, 3  ;;  %s206_s6 = scalar_lea.vmem [#allocation5], %s481_s18 }
  0x23   : > { %330 = vperm.xlu1 %559, %v298_v5   ;;  %359 = vperm.xlu2 %561, %v297_v14   ;;  %s384_s5 = scalar_lea.hbm %s848_s3, %s489_s29  ;;  %s386_s7 = sshll.u32 %s206_s6, 4  ;;  %s387_s7 = int_to_ptr.vmem [resolvable:$true] %s386_s7 }
  0x24   : > { %s388_s8 = sshll.u32 %s384_s5, 4  ;;  %s371_s15 = scalar_lea.sflag [#allocation4], %s782_s11  ;;  %s389_s8 = int_to_ptr.hbm [resolvable:$true] %s388_s8 }
  0x25   : > { %s613_s9 = sshra.s32 %s389_s8, 4  ;;  %s619_s18 = scalar_lea.hbm %s848_s3, 16  ;;  %s614_s9 = int_to_ptr.hbm [resolvable:$true] %s613_s9 }
  0x26   : > { %s615_s10 = scalar_lea.hbm %s614_s9, 8  ;;  %p620_p7 = scmp.lt.s32.totalorder %s614_s9, %s848_s3 }
  0x27   : > { %v564_v3 = vpop.eup %563  ;;  %p616_p4 = scmp.ne.s32.totalorder %s614_s9, %s615_s10  ;;  %p621_p8 = scmp.lt.s32.totalorder %s619_s18, %s615_s10 }
  0x28   : > { %v232_v6 = vmul.f32 4.0, %v564_v3  ;;  %v212_v8 = vld.sshfl [vmem:[#allocation1] sm:$0xff pattern:$0x75316420]  ;;  %vm236_vm1 = vweird.f32 %v564_v3 }
  0x29   : > { %v213_v9 = vld.sshfl [vmem:[#allocation1 + $0x8] sm:$0xff pattern:$0x75316420]  ;;  %v217_v10 = vsel %vm216_vm0, %v212_v8, 0.0  ;;  %p617_p5 = pnand %p616_p4, %p759_p9  ;;  %p622_p10 = por %p621_p8, %p620_p7 }
  0x2a   : > { %v233_v7 = vsub.f32 1.0, %v232_v6  ;;  %v224_v11 = vsel %vm216_vm0, %v213_v9, 0.0  ;;  %558 = vset.pattern.permute.xlu0 %v686_v12  ;;  %v218_v15 = vrot.slane %v217_v10, 4 }
  0x2b   : > { %560 = vset.pattern.permute.xlu1 %v687_v13  ;;  %v225_v16 = vrot.slane %v224_v11, 4  ;;  %316 = vperm.xlu0 %558, %v298_v5   ;;  %p618_p6 = pneg %p617_p5 }
  0x2c   : > { %344 = vperm.xlu1 %560, %v298_v5   ;;  %v234_v17 = vmul.f32 %v564_v3, %v233_v7  ;;  %v219_v18 = vadd.f32 %v218_v15, %v217_v10 }
  0x2d   : > { %v226_v19 = vadd.f32 %v225_v16, %v224_v11  ;;  %p623_p13 = pnand %p622_p10, %p618_p6 }
  0x2e   : > { %v220_v20 = vrot.slane %v219_v18, 2  ;;  %v235_v22 = vadd.f32 %v564_v3, %v234_v17 }
  0x2f   : > { %v227_v21 = vrot.slane %v226_v19, 2 }
  0x30   : > { %v221_v23 = vadd.f32 %v220_v20, %v219_v18  ;;  %v237_v27 = vsel %vm236_vm1, %v564_v3, %v235_v22 }
  0x31   : > { %v228_v24 = vadd.f32 %v227_v21, %v226_v19 }
  0x32   : > { %v222_v25 = vrot.slane %v221_v23, 1 }
  0x33   : > { %v229_v26 = vrot.slane %v228_v24, 1  ;;  %562 = vset.pattern.permute.xlu0 %v684_v1 }
  0x34   : > { %v223_v28 = vadd.f32 %v222_v25, %v221_v23 }
  0x35   : > { %v230_v29 = vadd.f32 %v229_v26, %v228_v24 }
  0x36   : > { %v238_v30 = vmul.f32 %v237_v27, %v223_v28 }
  0x37   : > { %v239_v31 = vmul.f32 %v237_v27, %v230_v29 }
  0x39   : > { %v242_v32 = vrot.slane %v239_v31, 4 }
  0x3b   : > { %v243_v33 = vsel %vm216_vm0, %v238_v30, %v242_v32 }
  0x3c   : > { %v245_v34 = vsub.f32 %v209_v4, %v243_v33 }
  0x3e   : > { %v246_v35 = vmul.f32 %v245_v34, %v245_v34 }
  0x40   : > { %248 = vst [vmem:[#allocation1] ss:$2 sm:$0xff] %v246_v35 }
  0x47   : > { %v249_v36 = vld.sshfl [vmem:[#allocation1] sm:$0xff pattern:$0x75316420]  ;;  %v250_v37 = vld.sshfl [vmem:[#allocation1 + $0x8] sm:$0xff pattern:$0x75316420] }
  0x48   : > { %v253_v38 = vsel %vm216_vm0, %v249_v36, 0.0  ;;  %v260_v39 = vsel %vm216_vm0, %v250_v37, 0.0 }
  0x49   : > { %v254_v40 = vrot.slane %v253_v38, 4  ;;  %v261_v41 = vrot.slane %v260_v39, 4 }
  0x4b   : > { %v255_v42 = vadd.f32 %v254_v40, %v253_v38  ;;  %v262_v43 = vadd.f32 %v261_v41, %v260_v39 }
  0x4d   : > { %v256_v44 = vrot.slane %v255_v42, 2  ;;  %v263_v45 = vrot.slane %v262_v43, 2 }
  0x4f   : > { %v257_v46 = vadd.f32 %v256_v44, %v255_v42  ;;  %v264_v47 = vadd.f32 %v263_v45, %v262_v43 }
  0x51   : > { %v258_v48 = vrot.slane %v257_v46, 1  ;;  %v265_v49 = vrot.slane %v264_v47, 1 }
  0x53   : > { %v259_v50 = vadd.f32 %v258_v48, %v257_v46  ;;  %v266_v51 = vadd.f32 %v265_v49, %v264_v47 }
  0x55   : > { %v267_v52 = vmul.f32 %v259_v50, %v237_v27  ;;  %v268_v53 = vmul.f32 %v266_v51, %v237_v27 }
  0x57   : > { %v269_v54 = vadd.f32 1e-05, %v267_v52  ;;  %v270_v55 = vadd.f32 1e-05, %v268_v53 }
  0x59   : > { %565 = vrsqrt.f32 %v269_v54  ;;  %vm277_vm2 = vweird.f32 %v269_v54  ;;  %vm287_vm4 = vweird.f32 %v270_v55 }
  0x5a   : > { %567 = vrsqrt.f32 %v270_v55 }
  0x5f   : > { %v566_v56 = vpop.eup %565 }
  0x60   : > { %v568_v57 = vpop.eup %567  ;;  %v272_v58 = vmul.f32 %v566_v56, %v269_v54  ;;  %vm278_vm3 = vweird.f32 %v566_v56 }
  0x61   : > { %v282_v59 = vmul.f32 %v568_v57, %v270_v55  ;;  %vm288_vm5 = vweird.f32 %v568_v57  ;;  %vm279_vm6 = vmor %vm277_vm2, %vm278_vm3 }
  0x62   : > { %v273_v60 = vmul.f32 %v566_v56, %v272_v58  ;;  %vm289_vm7 = vmor %vm287_vm4, %vm288_vm5 }
  0x63   : > { %v283_v61 = vmul.f32 %v568_v57, %v282_v59 }
  0x64   : > { %v274_v62 = vmul.f32 0.5, %v273_v60 }
  0x65   : > { %v284_v63 = vmul.f32 0.5, %v283_v61 }
  0x66   : > { %v275_v0 = vsub.f32 1.5, %v274_v62 }
  0x67   : > { %v285_v1 = vsub.f32 1.5, %v284_v63 }
  0x68   : > { %v276_v2 = vmul.f32 %v566_v56, %v275_v0 }
  0x69   : > { %v286_v3 = vmul.f32 %v568_v57, %v285_v1 }
  0x6a   : > { %v280_v4 = vsel %vm279_vm6, %v566_v56, %v276_v2 }
  0x6b   : > { %v290_v5 = vsel %vm289_vm7, %v568_v57, %v286_v3 }
  0x6c   : > { %v293_v6 = vrot.slane %v290_v5, 4 }
  0x6e   : > { %v294_v7 = vsel %vm216_vm0, %v280_v4, %v293_v6 }
  0x6f   : > { %v296_v8 = vmul.f32 %v294_v7, %v245_v34 }
  0x71   : > { %v305_v11 = vperm.slane %v296_v8, 0  ;;  %v306_v12 = vperm.slane %v296_v8, 4  ;;  %v319_v13 = vperm.slane %v296_v8, 1  ;;  %v320_v14 = vperm.slane %v296_v8, 5 }
  0x72   : > { %v333_v15 = vperm.slane %v296_v8, 2  ;;  %v334_v16 = vperm.slane %v296_v8, 6  ;;  %v347_v17 = vperm.slane %v296_v8, 3  ;;  %v348_v18 = vperm.slane %v296_v8, 7 }
  0x73   : > { %v309_v19 = vperm.slane %v305_v11, 0  ;;  %v310_v20 = vperm.slane %v306_v12, 0  ;;  %v323_v21 = vperm.slane %v319_v13, 1  ;;  %v324_v22 = vperm.slane %v320_v14, 1 }
  0x74   : > { %v337_v23 = vperm.slane %v333_v15, 2  ;;  %v338_v24 = vperm.slane %v334_v16, 2  ;;  %v351_v25 = vperm.slane %v347_v17, 3  ;;  %v352_v26 = vperm.slane %v348_v18, 3 }
  0x7d   : > { %v360_v41 = vpop.permute.xlu2 %359 }
  0x94   : > { %v302_v9 = vpop.permute.xlu0 %301 }
  0x95   : > { %v331_v10 = vpop.permute.xlu1 %330  ;;  %v311_v29 = vmul.f32 %v309_v19, %v302_v9  ;;  %v312_v30 = vmul.f32 %v310_v20, %v302_v9 }
  0x96   : > { %v339_v33 = vmul.f32 %v337_v23, %v331_v10  ;;  %v340_v34 = vmul.f32 %v338_v24, %v331_v10 }
  0x9d   : > { %v317_v27 = vpop.permute.xlu0 %316 }
  0x9e   : > { %v345_v28 = vpop.permute.xlu1 %344  ;;  %v325_v31 = vmul.f32 %v323_v21, %v317_v27  ;;  %v326_v32 = vmul.f32 %v324_v22, %v317_v27 }
  0x9f   : > { %v353_v37 = vmul.f32 %v351_v25, %v345_v28  ;;  %v354_v38 = vmul.f32 %v352_v26, %v345_v28 }
  0xa0   : > { %v327_v35 = vadd.f32 %v325_v31, %v311_v29  ;;  %v328_v36 = vadd.f32 %v326_v32, %v312_v30 }
  0xa2   : > { %v341_v39 = vadd.f32 %v339_v33, %v327_v35  ;;  %v342_v40 = vadd.f32 %v340_v34, %v328_v36 }
  0xa4   : > { %v355_v42 = vadd.f32 %v353_v37, %v341_v39  ;;  %v356_v43 = vadd.f32 %v354_v38, %v342_v40 }
  0xa6   : > { %v363_v44 = vadd.f32 %v360_v41, %v356_v43  ;;  %v362_v45 = vadd.f32 %v360_v41, %v355_v42 }
  0xa8   : > { %v366_v46 = vrot.slane %v363_v44, 4 }
  0xaa   : > { %v367_v47 = vsel %vm216_vm0, %v362_v45, %v366_v46 }
  0xab   : > { %369 = vst [vmem:[%s206_s6] sm:$0xff] %v367_v47 }
  0xac   : > { %626 = shalt.err (!%p623_p13)
}
  0xad   : > { %492 = dma.vmem_to_hbm [thread:$0]  (%p759_p9), %s387_s7, 128, %s389_s8, %s371_s15  }
  0xae PF: > { %s400_s11 = sand.u32 1, %s661_s12   ;;  %p499_p0 = pnand %p476_p12, %p766_p11 }
  0xaf   : > { %s401_s24 = scalar_lea.sflag [#allocation4], %s400_s11 }
  0xb0   : > { %p500_p1 = pneg %p499_p0 }
  0xb2   : > { %656 = dma.done.wait (%p500_p1), %s401_s24, 128  }
  0xb3   : > { %658 = vsyncadd (%p500_p1), %s401_s24, 4294967168  ;;  %s19_s17 = sadd.s32 1, %s681_s17   ;;  %s853_s12 = smov %s665_s13 }
  0xb4   : > { %p16_p2 = scmp.ge.s32.totalorder %s19_s17, 4   ;;  %s854_s13 = smov %s669_s14 }
  0xb5   : > { %s855_s14 = smov %s764_s26  ;;  %s856_s15 = smov %s677_s16 }
  0xb6   : > { %s857_s16 = smov %s859_s20  ;;  %18 = sbr.rel (!%p16_p2) target bundleno = 6 (0x6), region = 77 }
  0xbb   :  { %407 = vsyncpa [#allocation3], 1 }
  0xbc   :  { %409 = vsyncpa [#allocation3 + $0x1], 1 }
  0xbd   :  { %410 = vsyncpa [#allocation4], 1 }
  0xbe   :  { %412 = vsyncpa [#allocation4 + $0x1], 1 }

</bundles_post_ra>
